<compile_context>
chip_gen: v5e
topology: v5e:2x2
jax: 0.10.0
libtpu: 0.0.40
codegen_flags: <defaults>
</compile_context>

<pallas_src>
import functools

import jax
import jax.numpy as jnp
from jax.experimental import pallas as pl
from jax.experimental.pallas import tpu as pltpu


def _project3d_kernel(p_ref, pts_ref, out_ref, *, eps):
    """One (batch, row-tile) grid step.

    p_ref   : SMEM (B, 12)        flattened, pre-scaled (K @ T)[:, :3, :]
    pts_ref : VMEM (1, 4, R, 128) homogeneous 3D points, dense (8,128) tiles
    out_ref : VMEM (1, 2, R, 128) normalized pixel coords (x plane, y plane)
    """
    b = pl.program_id(0)

    def P(i, j):  # scalar read from SMEM
        return p_ref[b, i * 4 + j]

    # Dense (R, 128) tiles -> full vreg occupancy, unmasked stores.
    x = pts_ref[0, 0].astype(jnp.float32)
    y = pts_ref[0, 1].astype(jnp.float32)
    z = pts_ref[0, 2].astype(jnp.float32)
    w = pts_ref[0, 3].astype(jnp.float32)

    # cam = P[:3, :4] @ [x; y; z; w]  -- 12 VPU FMAs per element, no MXU.
    cam2 = P(2, 0) * x + P(2, 1) * y + P(2, 2) * z + P(2, 3) * w
    inv_z = 1.0 / (cam2 + eps)          # exact reciprocal keeps f32 accuracy

    cam0 = P(0, 0) * x + P(0, 1) * y + P(0, 2) * z + P(0, 3) * w
    cam1 = P(1, 0) * x + P(1, 1) * y + P(1, 2) * z + P(1, 3) * w

    # 2/(W-1) and 2/(H-1) are already folded into P rows 0/1 in the wrapper, so
    # the final coordinate is just cam * inv_z - 1.
    out_ref[0, 0] = cam0 * inv_z - 1.0
    out_ref[0, 1] = cam1 * inv_z - 1.0


def _pick_rows(rows_total, batch, target_rows=1024, min_parallel=4):
    """Rows (of 128 lanes) per grid step: multiple of 8 (or full extent),
    big enough to amortize per-step overhead, small enough that megacore
    (v7x, 2 TCs) still has >= `min_parallel` parallel grid steps."""
    if rows_total <= 8:
        return rows_total                      # full extent: always legal
    r = min(target_rows, rows_total)
    r = max(8, (r // 8) * 8)
    while batch * pl.cdiv(rows_total, r) < min_parallel and r > 8:
        r = max(8, (r // 2 // 8) * 8)
    return r


def project_3d(points, K, T, height, width, eps=1e-7,
               target_rows=1024, channels_last=True):
    """points: (B, 4, H*W), K: (B, 4, 4), T: (B, 4, 4) -> (B, H, W, 2) float32."""
    B, C, HW = points.shape
    assert C == 4 and HW == height * width

    # Tiny per-batch 4x4 matmul; keep it in the wrapper (negligible cost).
    P = jnp.einsum(
        "bij,bjk->bik",
        K.astype(jnp.float32),
        T.astype(jnp.float32),
        precision=jax.lax.Precision.HIGHEST,
    )[:, :3, :]                                           # (B, 3, 4)
    # Fold the output normalisation into the projection rows:
    #   (u/(W-1) - 0.5)*2 == u*(2/(W-1)) - 1   (row 2, the depth row, untouched).
    scale = jnp.array([2.0 / (width - 1), 2.0 / (height - 1), 1.0],
                      jnp.float32).reshape(1, 3, 1)
    P_flat = (P * scale).reshape(B, 12)                   # compact SMEM layout

    # View the HW axis as (rows, 128) lanes; pad only if HW isn't 128-aligned
    # (never the case for Monodepth2-style H, W, and free otherwise... almost).
    rows = pl.cdiv(HW, 128)
    if rows * 128 != HW:
        points = jnp.pad(points, ((0, 0), (0, 0), (0, rows * 128 - HW)))
    pts4 = points.reshape(B, 4, rows, 128)

    R = _pick_rows(rows, B, target_rows)
    grid = (B, pl.cdiv(rows, R))                          # ragged last block OK

    pix = pl.pallas_call(
        functools.partial(_project3d_kernel, eps=float(eps)),
        out_shape=jax.ShapeDtypeStruct((B, 2, rows, 128), jnp.float32),
        grid_spec=pltpu.PrefetchScalarGridSpec(
            num_scalar_prefetch=1,                        # P_flat -> SMEM scalars
            grid=grid,
            in_specs=[
                pl.BlockSpec((1, 4, R, 128), lambda b, t, p: (b, 0, t, 0)),
            ],
            out_specs=pl.BlockSpec((1, 2, R, 128), lambda b, t, p: (b, 0, t, 0)),
        ),
        compiler_params=pltpu.CompilerParams(
            dimension_semantics=("parallel", "parallel")
        ),
    )(P_flat, pts4)

    pix = pix.reshape(B, 2, rows * 128)[:, :, :HW]        # drop lane padding (free if aligned)
    if not channels_last:
        return pix.reshape(B, 2, height, width)           # channels-first, no extra HBM pass
    # TODO(synk): the channels-last permute is a standalone HBM relayout of the
    # output; consumers that accept (B, 2, H, W) should use channels_last=False.
    return pix.reshape(B, 2, height, width).transpose(0, 2, 3, 1)


def project_3d_ref(points, K, T, height, width, eps=1e-7):
    """Pure-JAX reference mirroring the PyTorch forward."""
    B = points.shape[0]
    hp = jax.lax.Precision.HIGHEST
    P = jnp.einsum("bij,bjk->bik", K, T, precision=hp)[:, :3, :]
    cam = jnp.einsum("bij,bjk->bik", P, points, precision=hp)       # (B, 3, HW)
    pix = cam[:, :2, :] / (cam[:, 2:3, :] + eps)
    pix = pix.reshape(B, 2, height, width).transpose(0, 2, 3, 1)    # (B, H, W, 2)
    scale = jnp.array([width - 1, height - 1], jnp.float32)
    pix = pix / scale
    return (pix - 0.5) * 2.0


if __name__ == "__main__":
    B, H, W = 2, 16, 16
    HW = H * W
    key = jax.random.PRNGKey(0)
    k1, k2, k3 = jax.random.split(key, 3)

    # Plausible homogeneous 3D points: x,y in [-5,5], z in [1,10], w = 1.
    xy = jax.random.uniform(k1, (B, 2, HW), jnp.float32, -5.0, 5.0)
    zz = jax.random.uniform(k2, (B, 1, HW), jnp.float32, 1.0, 10.0)
    ones = jnp.ones((B, 1, HW), jnp.float32)
    points = jnp.concatenate([xy, zz, ones], axis=1)                # (B, 4, HW)

    # Plausible intrinsics and near-identity pose.
    K = jnp.array(
        [[W / 2.0, 0.0, W / 2.0, 0.0],
         [0.0, H / 2.0, H / 2.0, 0.0],
         [0.0, 0.0, 1.0, 0.0],
         [0.0, 0.0, 0.0, 1.0]],
        jnp.float32,
    )
    K = jnp.broadcast_to(K, (B, 4, 4))
    T = jnp.broadcast_to(jnp.eye(4, dtype=jnp.float32), (B, 4, 4))
    T = T + 0.01 * jax.random.normal(k3, (B, 4, 4), jnp.float32)

    out = project_3d(points, K, T, H, W)
    out = jax.block_until_ready(out)

    ref = project_3d_ref(points, K, T, H, W)
    assert out.shape == (B, H, W, 2)
    assert jnp.allclose(out, ref, atol=2e-5, rtol=1e-5)
    print("KERNEL_OK")
</pallas_src>

<mosaic_0001>
module attributes {stable_mosaic.version = 11 : i64} {
  func.func @_project3d_kernel(%arg0: i32, %arg1: i32, %arg2: memref<2x12xf32, #tpu.memory_space<smem>>, %arg3: memref<1x4x2x128xf32, #tpu.memory_space<vmem>>, %arg4: memref<1x2x2x128xf32, #tpu.memory_space<vmem>>) attributes {dimension_semantics = [#tpu.dimension_semantics<parallel>, #tpu.dimension_semantics<parallel>], iteration_bounds = array<i64: 2, 1>, scalar_prefetch = 1 : i64, scratch_operands = 0 : i64, tpu.core_type = #tpu.core_type<tc>, window_params = [{transform_indices = @transform_0, window_bounds = array<i64: 1, 4, 2, 128>}, {transform_indices = @transform_1, window_bounds = array<i64: 1, 2, 2, 128>}]} {
    %c0 = arith.constant 0 : index
    %c0_0 = arith.constant 0 : index
    %c0_1 = arith.constant 0 : index
    %c0_2 = arith.constant 0 : index
    %0 = vector.load %arg3[%c0, %c0_0, %c0_1, %c0_2] : memref<1x4x2x128xf32, #tpu.memory_space<vmem>>, vector<1x1x2x128xf32>
    %1 = vector.shape_cast %0 : vector<1x1x2x128xf32> to vector<2x128xf32>
    %c0_3 = arith.constant 0 : index
    %c1 = arith.constant 1 : index
    %c0_4 = arith.constant 0 : index
    %c0_5 = arith.constant 0 : index
    %2 = vector.load %arg3[%c0_3, %c1, %c0_4, %c0_5] : memref<1x4x2x128xf32, #tpu.memory_space<vmem>>, vector<1x1x2x128xf32>
    %3 = vector.shape_cast %2 : vector<1x1x2x128xf32> to vector<2x128xf32>
    %c0_6 = arith.constant 0 : index
    %c2 = arith.constant 2 : index
    %c0_7 = arith.constant 0 : index
    %c0_8 = arith.constant 0 : index
    %4 = vector.load %arg3[%c0_6, %c2, %c0_7, %c0_8] : memref<1x4x2x128xf32, #tpu.memory_space<vmem>>, vector<1x1x2x128xf32>
    %5 = vector.shape_cast %4 : vector<1x1x2x128xf32> to vector<2x128xf32>
    %c0_9 = arith.constant 0 : index
    %c3 = arith.constant 3 : index
    %c0_10 = arith.constant 0 : index
    %c0_11 = arith.constant 0 : index
    %6 = vector.load %arg3[%c0_9, %c3, %c0_10, %c0_11] : memref<1x4x2x128xf32, #tpu.memory_space<vmem>>, vector<1x1x2x128xf32>
    %7 = vector.shape_cast %6 : vector<1x1x2x128xf32> to vector<2x128xf32>
    %8 = arith.index_cast %arg0 : i32 to index
    %c8 = arith.constant 8 : index
    %9 = memref.load %arg2[%8, %c8] : memref<2x12xf32, #tpu.memory_space<smem>>
    %10 = vector.broadcast %9 : f32 to vector<2x128xf32>
    %11 = arith.mulf %10, %1 : vector<2x128xf32>
    %12 = arith.index_cast %arg0 : i32 to index
    %c9 = arith.constant 9 : index
    %13 = memref.load %arg2[%12, %c9] : memref<2x12xf32, #tpu.memory_space<smem>>
    %14 = vector.broadcast %13 : f32 to vector<2x128xf32>
    %15 = arith.mulf %14, %3 : vector<2x128xf32>
    %16 = arith.addf %11, %15 : vector<2x128xf32>
    %17 = arith.index_cast %arg0 : i32 to index
    %c10 = arith.constant 10 : index
    %18 = memref.load %arg2[%17, %c10] : memref<2x12xf32, #tpu.memory_space<smem>>
    %19 = vector.broadcast %18 : f32 to vector<2x128xf32>
    %20 = arith.mulf %19, %5 : vector<2x128xf32>
    %21 = arith.addf %16, %20 : vector<2x128xf32>
    %22 = arith.index_cast %arg0 : i32 to index
    %c11 = arith.constant 11 : index
    %23 = memref.load %arg2[%22, %c11] : memref<2x12xf32, #tpu.memory_space<smem>>
    %24 = vector.broadcast %23 : f32 to vector<2x128xf32>
    %25 = arith.mulf %24, %7 : vector<2x128xf32>
    %26 = arith.addf %21, %25 : vector<2x128xf32>
    %cst = arith.constant 1.000000e-07 : f32
    %27 = vector.broadcast %cst : f32 to vector<2x128xf32>
    %28 = arith.addf %26, %27 : vector<2x128xf32>
    %cst_12 = arith.constant 1.000000e+00 : f32
    %29 = vector.broadcast %cst_12 : f32 to vector<2x128xf32>
    %30 = arith.divf %29, %28 : vector<2x128xf32>
    %31 = arith.index_cast %arg0 : i32 to index
    %c0_13 = arith.constant 0 : index
    %32 = memref.load %arg2[%31, %c0_13] : memref<2x12xf32, #tpu.memory_space<smem>>
    %33 = vector.broadcast %32 : f32 to vector<2x128xf32>
    %34 = arith.mulf %33, %1 : vector<2x128xf32>
    %35 = arith.index_cast %arg0 : i32 to index
    %c1_14 = arith.constant 1 : index
    %36 = memref.load %arg2[%35, %c1_14] : memref<2x12xf32, #tpu.memory_space<smem>>
    %37 = vector.broadcast %36 : f32 to vector<2x128xf32>
    %38 = arith.mulf %37, %3 : vector<2x128xf32>
    %39 = arith.addf %34, %38 : vector<2x128xf32>
    %40 = arith.index_cast %arg0 : i32 to index
    %c2_15 = arith.constant 2 : index
    %41 = memref.load %arg2[%40, %c2_15] : memref<2x12xf32, #tpu.memory_space<smem>>
    %42 = vector.broadcast %41 : f32 to vector<2x128xf32>
    %43 = arith.mulf %42, %5 : vector<2x128xf32>
    %44 = arith.addf %39, %43 : vector<2x128xf32>
    %45 = arith.index_cast %arg0 : i32 to index
    %c3_16 = arith.constant 3 : index
    %46 = memref.load %arg2[%45, %c3_16] : memref<2x12xf32, #tpu.memory_space<smem>>
    %47 = vector.broadcast %46 : f32 to vector<2x128xf32>
    %48 = arith.mulf %47, %7 : vector<2x128xf32>
    %49 = arith.addf %44, %48 : vector<2x128xf32>
    %50 = arith.index_cast %arg0 : i32 to index
    %c4 = arith.constant 4 : index
    %51 = memref.load %arg2[%50, %c4] : memref<2x12xf32, #tpu.memory_space<smem>>
    %52 = vector.broadcast %51 : f32 to vector<2x128xf32>
    %53 = arith.mulf %52, %1 : vector<2x128xf32>
    %54 = arith.index_cast %arg0 : i32 to index
    %c5 = arith.constant 5 : index
    %55 = memref.load %arg2[%54, %c5] : memref<2x12xf32, #tpu.memory_space<smem>>
    %56 = vector.broadcast %55 : f32 to vector<2x128xf32>
    %57 = arith.mulf %56, %3 : vector<2x128xf32>
    %58 = arith.addf %53, %57 : vector<2x128xf32>
    %59 = arith.index_cast %arg0 : i32 to index
    %c6 = arith.constant 6 : index
    %60 = memref.load %arg2[%59, %c6] : memref<2x12xf32, #tpu.memory_space<smem>>
    %61 = vector.broadcast %60 : f32 to vector<2x128xf32>
    %62 = arith.mulf %61, %5 : vector<2x128xf32>
    %63 = arith.addf %58, %62 : vector<2x128xf32>
    %64 = arith.index_cast %arg0 : i32 to index
    %c7 = arith.constant 7 : index
    %65 = memref.load %arg2[%64, %c7] : memref<2x12xf32, #tpu.memory_space<smem>>
    %66 = vector.broadcast %65 : f32 to vector<2x128xf32>
    %67 = arith.mulf %66, %7 : vector<2x128xf32>
    %68 = arith.addf %63, %67 : vector<2x128xf32>
    %69 = arith.mulf %49, %30 : vector<2x128xf32>
    %cst_17 = arith.constant 1.000000e+00 : f32
    %70 = vector.broadcast %cst_17 : f32 to vector<2x128xf32>
    %71 = arith.subf %69, %70 : vector<2x128xf32>
    %c0_18 = arith.constant 0 : index
    %c0_19 = arith.constant 0 : index
    %c0_20 = arith.constant 0 : index
    %c0_21 = arith.constant 0 : index
    %72 = vector.load %arg4[%c0_18, %c0_19, %c0_20, %c0_21] : memref<1x2x2x128xf32, #tpu.memory_space<vmem>>, vector<1x1x2x128xf32>
    %73 = vector.shape_cast %72 : vector<1x1x2x128xf32> to vector<2x128xf32>
    %74 = vector.shape_cast %71 : vector<2x128xf32> to vector<1x1x2x128xf32>
    tpu.vector_store %arg4[%c0_18, %c0_19, %c0_20, %c0_21], %74 {strides = array<i32>} : memref<1x2x2x128xf32, #tpu.memory_space<vmem>>, vector<1x1x2x128xf32>,
    %75 = arith.mulf %68, %30 : vector<2x128xf32>
    %cst_22 = arith.constant 1.000000e+00 : f32
    %76 = vector.broadcast %cst_22 : f32 to vector<2x128xf32>
    %77 = arith.subf %75, %76 : vector<2x128xf32>
    %c0_23 = arith.constant 0 : index
    %c1_24 = arith.constant 1 : index
    %c0_25 = arith.constant 0 : index
    %c0_26 = arith.constant 0 : index
    %78 = vector.load %arg4[%c0_23, %c1_24, %c0_25, %c0_26] : memref<1x2x2x128xf32, #tpu.memory_space<vmem>>, vector<1x1x2x128xf32>
    %79 = vector.shape_cast %78 : vector<1x1x2x128xf32> to vector<2x128xf32>
    %80 = vector.shape_cast %77 : vector<2x128xf32> to vector<1x1x2x128xf32>
    tpu.vector_store %arg4[%c0_23, %c1_24, %c0_25, %c0_26], %80 {strides = array<i32>} : memref<1x2x2x128xf32, #tpu.memory_space<vmem>>, vector<1x1x2x128xf32>,
    return
  }
  func.func @transform_0(%arg0: i32, %arg1: i32, %arg2: memref<2x12xf32, #tpu.memory_space<smem>>) -> (i32, i32, i32, i32) {
    %c0_i32 = arith.constant 0 : i32
    %c0_i32_0 = arith.constant 0 : i32
    %c0_i32_1 = arith.constant 0 : i32
    return %arg0, %c0_i32, %arg1, %c0_i32_0 : i32, i32, i32, i32
  }
  func.func @transform_1(%arg0: i32, %arg1: i32, %arg2: memref<2x12xf32, #tpu.memory_space<smem>>) -> (i32, i32, i32, i32) {
    %c0_i32 = arith.constant 0 : i32
    %c0_i32_0 = arith.constant 0 : i32
    %c0_i32_1 = arith.constant 0 : i32
    return %arg0, %c0_i32, %arg1, %c0_i32_0 : i32, i32, i32, i32
  }
}

</mosaic_0001>

<bundles_post_ra>
// kernel: tpu_custom_call.1
= control target key start
LH: loop header
LB: loop body
LE: loop exit
PB: predicated region body
PF: predicated region fallthrough
CT: control target
= control target key end

     0   :  { %s573_s12 = smov [#allocation3]   ;;  %s732_s0 = inlined_call_operand.hbm [shape: f32[2,12], index: 0, kind: input, shape index: {}]   ;;  %s733_s1 = inlined_call_operand.hbm [shape: f32[2,4,2,128], index: 1, kind: input, shape index: {}]   ;;  %s734_s2 = inlined_call_operand.hbm [shape: f32[2,2,2,128], index: 2, kind: output, shape index: {}]  }
   0x1   :  { %s8_s11 = sshll.u32 %s732_s0, 4  ;;  %s9_s11 = int_to_ptr.hbm [resolvable:$true] %s8_s11 }
   0x2   :  { %11 = dma.hbm_to_smem %s9_s11, 32, %s573_s12, [#allocation2] }
   0x3   :  { %539 = dma.done.wait [#allocation2], 32 }
   0x4   :  { %540 = vsyncadd [#allocation2], 4294967264 }
   0x5   :  { %14 = sfence }
   0x6   :  { %15 = vsyncpa [#allocation5], 0 }
   0x7   :  { %17 = vsyncpa [#allocation5 + $0x1], 0 }
   0x8   :  { %18 = vsyncpa [#allocation6], 0 }
   0x9   :  { %20 = vsyncpa [#allocation6 + $0x1], 0  ;;  %s596_s13 = smov 0   ;;  %s598_s14 = smov 0  }
   0xa   :  { %s600_s15 = smov 0   ;;  %s602_s16 = smov 0  }
   0xb   :  { %s604_s17 = smov 0   ;;  %s606_s0 = smov 0  }
   0xc LB: > { %s352_s18 = sadd.s32 4294967295, %s571_s0   ;;  %s353_s19 = sadd.s32 4294967294, %s571_s0   ;;  %s571_s0 = sphi %s606_s0, %s26_s0   ;;  %s567_s17 = sphi %s604_s17, %s743_s17   ;;  %s563_s16 = sphi %s602_s16, %s742_s16   ;;  %s559_s15 = sphi %s600_s15, %s741_s15   ;;  %s555_s14 = sphi %s598_s14, %s740_s14   ;;  %s551_s13 = sphi %s596_s13, %s739_s13  }
   0xd   : > { %s38_s20 = sadd.s32 1, %s567_s17  ;;  %s47_s21 = sadd.s32 1, %s559_s15 }
   0xe   : > { %p40_p0 = scmp.ge.s32.totalorder %s38_s20, 2  ;;  %p54_p1 = scmp.ne.s32.totalorder %s559_s15, %s555_s14 }
   0xf   : > { %p55_p2 = scmp.eq.s32.totalorder %s571_s0, 0  ;;  %p60_p3 = scmp.ne.s32.totalorder %s555_s14, %s551_s13 }
  0x10   : > { %s745_s20 = smov (%p40_p0, %s38_s20), 0  ;;  %p61_p5 = scmp.eq.s32.totalorder %s352_s18, 0 }
  0x11   : > { %p637_p4 = por %p55_p2, %p54_p1  ;;  %s42_s23 = ssub.s32 %s567_s17, %s745_s20 }
  0x12   : > { %p86_p6 = scmp.eq.s32.totalorder %s352_s18, 1  ;;  %p45_p7 = scmp.eq.s32.totalorder %s42_s23, 0 }
  0x13   : > { %p643_p8 = por %p61_p5, %p60_p3  ;;  %p92_p10 = scmp.eq.s32.totalorder %s353_s19, 1 }
  0x14   : > { %p647_p9 = por %p86_p6, %p54_p1  ;;  %p355_p12 = scmp.ge.s32.totalorder %s571_s0, 2 }
  0x15   : > { %s652_s26 = scalar_select %p45_p7, %s559_s15, %s47_s21  }
  0x16   : > { %p654_p11 = por %p92_p10, %p60_p3  ;;  %p388_p13 = scmp.lt.s32.totalorder %s571_s0, 2 }
  0x17   : > { %s112_s28 = sand.u32 1, %s559_s15   ;;  %s374_s30 = sshll.u32 %s567_s17, 3 }
  0x18   : > { %s356_s29 = sshll.u32 %s112_s28, 3  ;;  %s122_s5 = scalar_lea.hbm %s733_s1, %s374_s30 }
  0x19   : > { %s116_s6 = scalar_lea.vmem [#allocation4], %s356_s29  ;;  %s123_s8 = sshll.u32 %s122_s5, 4  ;;  %s124_s8 = int_to_ptr.hbm [resolvable:$true] %s123_s8 }
  0x1a   : > { %s125_s7 = sshll.u32 %s116_s6, 4  ;;  %p381_p0 = pnand %p388_p13, %p637_p4  ;;  %s126_s7 = int_to_ptr.vmem [resolvable:$true] %s125_s7 }
  0x1b   : > { %p359_p1 = scmp.ge.s32.totalorder %s571_s0, 1  ;;  %s113_s9 = scalar_lea.sflag [#allocation5], %s112_s28 }
  0x1c   : > { %s574_s10 = smov 32   ;;  %s575_s11 = smov 2  }
  0x1d   : > { %383 = dma.hbm_to_vmem [thread:$0]  (!%p381_p0), %s124_s8, 128, %s126_s7, %s113_s9, %s574_s10, %s574_s10, %s575_s11  }
  0x1e   : > { %p133_p2 = scmp.lt.s32.totalorder %s571_s0, 3 }
  0x20   : > { %p134_p3 = pnand %p359_p1, %p133_p2 }
  0x21   : > { %s670_s12 = sand.u32 (!%p134_p3), 1, %s555_s14  }
  0x22   : > { %137 = sbr.rel (%p134_p3) target bundleno = 86 (0x56), region = 24  ;;  %s360_s18 = sshll.u32 (!%p134_p3), %s670_s12, 3 }
  0x23   : > { %s140_s19 = scalar_lea.sflag (!%p134_p3), [#allocation5], %s670_s12  ;;  %s143_s21 = scalar_lea.vmem (!%p134_p3), [#allocation4], %s360_s18 }
  0x27   : > { %542 = dma.done.wait (%p643_p8), %s140_s19, 128  }
  0x28   : > { %544 = vsyncadd (%p643_p8), %s140_s19, 4294967168  ;;  %s679_s22 = sshll.u32 %s563_s16, 7  ;;  %v163_v0 = vld [vmem:[%s143_s21] sm:$0x3]  ;;  %v362_v1 = vld [vmem:[%s143_s21 + $0x2] sm:$0x3] }
  0x29   : > { %s171_s23 = sadd.s32 8, %s679_s22  ;;  %s175_s29 = sadd.s32 9, %s679_s22  ;;  %v363_v2 = vld [vmem:[%s143_s21 + $0x4] sm:$0x3]  ;;  %v364_v4 = vld [vmem:[%s143_s21 + $0x6] sm:$0x3] }
  0x2a   : > { %s172_s28 = sld [smem:[#allocation3 + %s171_s23]]  ;;  %s180_s3 = sadd.s32 10, %s679_s22 }
  0x2b   : > { %s176_s30 = sld [smem:[#allocation3 + %s175_s29]]  ;;  %s185_s5 = sadd.s32 11, %s679_s22 }
  0x2c   : > { %s181_s4 = sld [smem:[#allocation3 + %s180_s3]]  ;;  %s209_s24 = sadd.s32 1, %s679_s22 }
  0x2d   : > { %s186_s6 = sld [smem:[#allocation3 + %s185_s5]]  ;;  %s214_s7 = sadd.s32 2, %s679_s22 }
  0x2e   : > { %s206_s8 = sld [smem:[#allocation3 + %s679_s22]]  ;;  %s224_s11 = sadd.s32 4, %s679_s22 }
  0x2f   : > { %s210_s9 = sld [smem:[#allocation3 + %s209_s24]]  ;;  %s228_s18 = sadd.s32 5, %s679_s22 }
  0x30   : > { %v173_v3 = vstv %s172_s28  ;;  %s215_s10 = sld [smem:[#allocation3 + %s214_s7]]  ;;  %s233_s23 = sadd.s32 6, %s679_s22 }
  0x31   : > { %v174_v5 = vmul.f32 %v173_v3, %v163_v0  ;;  %v177_v6 = vstv %s176_s30  ;;  %s225_s19 = sld [smem:[#allocation3 + %s224_s11]]  ;;  %s219_s28 = sadd.s32 3, %s679_s22 }
  0x32   : > { %v178_v7 = vmul.f32 %v362_v1, %v177_v6  ;;  %v182_v8 = vstv %s181_s4  ;;  %s229_s29 = sld [smem:[#allocation3 + %s228_s18]]  ;;  %s238_s21 = sadd.s32 7, %s679_s22 }
  0x33   : > { %v183_v9 = vmul.f32 %v363_v2, %v182_v8  ;;  %v187_v10 = vstv %s186_s6  ;;  %s234_s3 = sld [smem:[#allocation3 + %s233_s23]]  ;;  %s361_s22 = sshll.u32 %s670_s12, 2 }
  0x34   : > { %v179_v11 = vadd.f32 %v178_v7, %v174_v5  ;;  %v188_v12 = vmul.f32 %v364_v4, %v187_v10  ;;  %s220_s30 = sld [smem:[#allocation3 + %s219_s28]]  ;;  %v207_v15 = vstv %s206_s8  ;;  %s375_s5 = sshll.u32 %s563_s16, 2 }
  0x35   : > { %v211_v16 = vstv %s210_s9  ;;  %s239_s4 = sld [smem:[#allocation3 + %s238_s21]]  ;;  %v208_v20 = vmul.f32 %v207_v15, %v163_v0  ;;  %s263_s7 = scalar_lea.hbm %s734_s2, %s375_s5 }
  0x36   : > { %v184_v13 = vadd.f32 %v183_v9, %v179_v11  ;;  %v212_v21 = vmul.f32 %v362_v1, %v211_v16  ;;  %v216_v22 = vstv %s215_s10  ;;  %s162_s8 = scalar_lea.vmem [#allocation7], %s361_s22  ;;  %s266_s10 = sshll.u32 %s263_s7, 4  ;;  %s267_s10 = int_to_ptr.hbm [resolvable:$true] %s266_s10 }
  0x37   : > { %v226_v18 = vstv %s225_s19  ;;  %v217_v27 = vmul.f32 %v363_v2, %v216_v22  ;;  %s264_s9 = sshll.u32 %s162_s8, 4  ;;  %s251_s16 = scalar_lea.sflag [#allocation6], %s670_s12  ;;  %s265_s9 = int_to_ptr.vmem [resolvable:$true] %s264_s9 }
  0x38   : > { %v189_v14 = vadd.f32 %v188_v12, %v184_v13  ;;  %v230_v19 = vstv %s229_s29  ;;  %v227_v23 = vmul.f32 %v226_v18, %v163_v0  ;;  %v213_v26 = vadd.f32 %v212_v21, %v208_v20  ;;  %s501_s11 = sshra.s32 %s267_s10, 4  ;;  %s507_s28 = scalar_lea.hbm %s734_s2, 8  ;;  %s502_s11 = int_to_ptr.hbm [resolvable:$true] %s501_s11 }
  0x39   : > { %v231_v24 = vmul.f32 %v362_v1, %v230_v19  ;;  %v235_v25 = vstv %s234_s3  ;;  %s503_s18 = scalar_lea.hbm %s502_s11, 4  ;;  %p508_p7 = scmp.lt.s32.totalorder %s502_s11, %s734_s2 }
  0x3a   : > { %v190_v17 = vadd.f32 1e-07, %v189_v14  ;;  %v221_v28 = vstv %s220_s30  ;;  %v236_v30 = vmul.f32 %v363_v2, %v235_v25  ;;  %v218_v37 = vadd.f32 %v217_v27, %v213_v26  ;;  %p504_p4 = scmp.ne.s32.totalorder %s502_s11, %s503_s18  ;;  %p509_p8 = scmp.lt.s32.totalorder %s507_s28, %s503_s18 }
  0x3b   : > { %v232_v29 = vadd.f32 %v231_v24, %v227_v23  ;;  %v240_v32 = vstv %s239_s4  ;;  %v222_v34 = vmul.f32 %v364_v4, %v221_v28 }
  0x3c   : > { %443 = vrcp.f32 %v190_v17  ;;  %vm196_vm0 = vweird.f32 %v190_v17  ;;  %v200_v35 = vand.u32 2147483647, %v190_v17  ;;  %v202_v36 = vand.u32 2147483648, %v190_v17  ;;  %p505_p5 = pnand %p504_p4, %p647_p9  ;;  %p510_p10 = por %p509_p8, %p508_p7 }
  0x3d   : > { %v237_v39 = vadd.f32 %v236_v30, %v232_v29  ;;  %v241_v40 = vmul.f32 %v364_v4, %v240_v32  ;;  %v223_v44 = vadd.f32 %v222_v34, %v218_v37 }
  0x3e   : > { %v203_v42 = vor.u32 1.1754944e-38, %v202_v36  ;;  %vm201_vm3 = vcmp.eq.f32.partialorder %v200_v35, 8.507059e+37  ;;  %p506_p6 = pneg %p505_p5 }
  0x3f   : > { %v242_v45 = vadd.f32 %v241_v40, %v237_v39 }
  0x40   : > { %p511_p13 = pnand %p510_p10, %p506_p6 }
  0x42   : > { %v444_v31 = vpop.eup %443 }
  0x43   : > { %v192_v33 = vmul.f32 %v444_v31, %v190_v17  ;;  %vm197_vm1 = vweird.f32 %v444_v31 }
  0x44   : > { %vm198_vm2 = vmor %vm196_vm0, %vm197_vm1 }
  0x45   : > { %v193_v38 = vsub.f32 1.0, %v192_v33 }
  0x47   : > { %v194_v41 = vmul.f32 %v444_v31, %v193_v38 }
  0x49   : > { %v195_v43 = vadd.f32 %v444_v31, %v194_v41 }
  0x4b   : > { %v199_v46 = vsel %vm198_vm2, %v444_v31, %v195_v43 }
  0x4c   : > { %v204_v47 = vsel %vm201_vm3, %v203_v42, %v199_v46 }
  0x4d   : > { %v243_v48 = vmul.f32 %v223_v44, %v204_v47  ;;  %v246_v49 = vmul.f32 %v242_v45, %v204_v47 }
  0x4f   : > { %v366_v50 = vadd.f32 -1.0, %v243_v48  ;;  %v367_v51 = vadd.f32 -1.0, %v246_v49 }
  0x51   : > { %245 = vst [vmem:[%s162_s8] sm:$0x3] %v366_v50 }
  0x52   : > { %368 = vst [vmem:[%s162_s8 + $0x2] sm:$0x3] %v367_v51 }
  0x53   : > { %514 = shalt.err (!%p511_p13)
}
  0x54   : > { %s576_s12 = smov 32   ;;  %s577_s21 = smov 2  }
  0x55   : > { %378 = dma.vmem_to_hbm [thread:$0]  (%p647_p9), %s265_s9, 64, %s267_s10, %s251_s16, %s576_s12, %s576_s12, %s577_s21  }
  0x56 PF: > { %s281_s30 = sand.u32 1, %s551_s13   ;;  %p385_p0 = pnand %p355_p12, %p654_p11 }
  0x57   : > { %s282_s4 = scalar_lea.sflag [#allocation6], %s281_s30 }
  0x58   : > { %p386_p1 = pneg %p385_p0 }
  0x5a   : > { %546 = dma.done.wait (%p386_p1), %s282_s4, 64  }
  0x5b   : > { %548 = vsyncadd (%p386_p1), %s282_s4, 4294967232  ;;  %s26_s0 = sadd.s32 1, %s571_s0   ;;  %s739_s13 = smov %s555_s14 }
  0x5c   : > { %p23_p2 = scmp.ge.s32.totalorder %s26_s0, 4   ;;  %s740_s14 = smov %s559_s15 }
  0x5d   : > { %s741_s15 = smov %s652_s26  ;;  %s742_s16 = smov %s567_s17 }
  0x5e   : > { %s743_s17 = smov %s745_s20  ;;  %25 = sbr.rel (!%p23_p2) target bundleno = 12 (0xc), region = 73 }
  0x63   :  { %288 = vsyncpa [#allocation5], 1 }
  0x64   :  { %290 = vsyncpa [#allocation5 + $0x1], 1 }
  0x65   :  { %291 = vsyncpa [#allocation6], 1 }
  0x66   :  { %293 = vsyncpa [#allocation6 + $0x1], 1 }

</bundles_post_ra>
